<compile_context>
chip_gen: v7x
topology: tpu7x:2x2x1
jax: 0.10.0
libtpu: 0.0.40
codegen_flags: <defaults>
</compile_context>

<pallas_src>
import functools

import jax
import jax.numpy as jnp
from jax import lax
from jax.experimental import pallas as pl
from jax.experimental.pallas import tpu as pltpu


def _round_up(x, m):
    return (x + m - 1) // m * m


def _vmem_budget_bytes():
    """Usable per-core VMEM (generation-aware), with a conservative fallback."""
    cap = 64 << 20                      # v7x per-TC physical VMEM (most restrictive)
    try:
        info = pltpu.get_tpu_info()
        cap = int(getattr(info, "vmem_capacity_bytes", cap))
    except Exception:
        pass
    return int(cap * 0.8)


# ----------------------------- kernels -------------------------------------


def _fused_kernel(beta_ref, x_ref, o_ref, *, compute_dtype):
    """out = beta * (softmax(x @ x^T)^T @ x) + x for one whole (C, HW) map."""
    x = x_ref[...]                                            # (C, HWp)
    xm = x if compute_dtype is None else x.astype(compute_dtype)
    # energy = x @ x^T (contract the HW axis of both operands; f32 accumulation).
    e = lax.dot_general(xm, xm, dimension_numbers=(((1,), (1,)), ((), ())),
                        preferred_element_type=jnp.float32)   # (C, C), symmetric
    # E is symmetric, so its *column* softmax is softmax(E)^T -- i.e. we build
    # the already-transposed attention the second matmul wants.
    e = e - jnp.max(e, axis=0, keepdims=True)
    p = jnp.exp(e)
    attn_t = (p / jnp.sum(p, axis=0, keepdims=True)).astype(xm.dtype)
    y = jnp.dot(attn_t, xm, preferred_element_type=jnp.float32)   # (C, HWp)
    o_ref[...] = (beta_ref[0] * y).astype(o_ref.dtype) + x        # residual in x.dtype


def _energy_kernel(x_ref, attn_t_ref, acc_ref, *, compute_dtype):
    """Accumulate E = x @ x^T over HW tiles; write softmax(E)^T at the last tile."""
    k = pl.program_id(1)

    @pl.when(k == 0)
    def _():
        acc_ref[...] = jnp.zeros_like(acc_ref)

    x = x_ref[...]                                            # (C, tile)
    if compute_dtype is not None:
        x = x.astype(compute_dtype)
    acc_ref[...] += lax.dot_general(x, x, dimension_numbers=(((1,), (1,)), ((), ())),
                                    preferred_element_type=jnp.float32)

    @pl.when(k == pl.num_programs(1) - 1)
    def _():
        e = acc_ref[...]
        e = e - jnp.max(e, axis=0, keepdims=True)             # column softmax == softmax(E)^T
        p = jnp.exp(e)
        attn_t_ref[...] = (p / jnp.sum(p, axis=0, keepdims=True)).astype(attn_t_ref.dtype)


def _energy_kernel_blocked(x_ref, xr_ref, attn_t_ref, acc_ref, *, compute_dtype):
    """Column-blocked pass 1: E[:, j_blk] = x @ x[j_blk]^T.  The column softmax
    (axis 0) is local to each (C, tc) slab, so blocks are fully independent."""
    k = pl.program_id(2)

    @pl.when(k == 0)
    def _():
        acc_ref[...] = jnp.zeros_like(acc_ref)

    x = x_ref[...]                                            # (C, tile)
    xr = xr_ref[...]                                          # (tc, tile)
    if compute_dtype is not None:
        x = x.astype(compute_dtype)
        xr = xr.astype(compute_dtype)
    acc_ref[...] += lax.dot_general(x, xr, dimension_numbers=(((1,), (1,)), ((), ())),
                                    preferred_element_type=jnp.float32)

    @pl.when(k == pl.num_programs(2) - 1)
    def _():
        e = acc_ref[...]
        e = e - jnp.max(e, axis=0, keepdims=True)
        p = jnp.exp(e)
        attn_t_ref[...] = (p / jnp.sum(p, axis=0, keepdims=True)).astype(attn_t_ref.dtype)


def _apply_kernel(beta_ref, attn_t_ref, x_ref, o_ref, *, compute_dtype):
    """out = beta * (attn^T @ x) + x for one (C, tile) slab (plain (1,0) matmul)."""
    x = x_ref[...]                                            # (C, tile)
    a = attn_t_ref[...]                                       # (C, C) = softmax(E)^T
    if compute_dtype is not None:
        a = a.astype(compute_dtype)
        xm = x.astype(compute_dtype)
    else:
        xm = x
    y = jnp.dot(a, xm, preferred_element_type=jnp.float32)
    o_ref[...] = (beta_ref[0] * y).astype(o_ref.dtype) + x    # residual in x.dtype


# ----------------------------- wrapper --------------------------------------


def da_channel_attention(x, beta, *, hw_tile=None, n_cblk=None, fuse=None,
                         compute_dtype=None):
    """DANet channel attention forward.

    x: (B, C, H, W); beta: (1,) float32 (the module's learnable scalar).
    hw_tile: optional cap on the spatial tile (two-pass path); default derived
             from the VMEM budget.
    n_cblk:  optional number of pass-1 energy-column blocks (C % n_cblk == 0 and
             C/n_cblk a multiple of 128); default 2 for large C, else 1.
    fuse:    force the fused single-pass path; default auto from the VMEM budget.
    compute_dtype: optional dtype (e.g. jnp.bfloat16) for the matmul operands;
             accumulation stays f32, the residual add stays in x.dtype.
    """
    b, c, h, w = x.shape
    hw = h * w
    itemsize = jnp.dtype(x.dtype).itemsize
    cd_size = itemsize if compute_dtype is None else jnp.dtype(compute_dtype).itemsize

    budget = _vmem_budget_bytes()            # generation-aware (v7x: 64 MiB physical)
    hw_pad128 = _round_up(hw, 128)           # lane alignment only

    # ---- fused single-pass path: x resident per batch, 1 read + 1 write ----
    fused_bytes = (4 * c * hw_pad128 * itemsize           # in/out tiles, double-buffered
                   + c * hw_pad128 * (4 + cd_size)         # f32 y + possible operand cast
                   + 3 * c * c * 4)                        # energy / probs / attn^T temps
    if fuse is None:
        fuse = fused_bytes <= int(0.6 * budget)

    xf = x.reshape(b, c, hw)

    if fuse:
        if hw_pad128 != hw:
            xf = jnp.pad(xf, ((0, 0), (0, 0), (0, hw_pad128 - hw)))
        out = pl.pallas_call(
            functools.partial(_fused_kernel, compute_dtype=compute_dtype),
            out_shape=jax.ShapeDtypeStruct((b, c, hw_pad128), x.dtype),
            grid=(b,),
            in_specs=[
                pl.BlockSpec(memory_space=pltpu.MemorySpace.SMEM),            # beta (1,)
                pl.BlockSpec((pl.Squeezed(), c, hw_pad128), lambda i: (i, 0, 0)),
            ],
            out_specs=pl.BlockSpec((pl.Squeezed(), c, hw_pad128), lambda i: (i, 0, 0)),
            compiler_params=pltpu.CompilerParams(
                dimension_semantics=("parallel",),
                vmem_limit_bytes=budget,
            ),
        )(beta, xf)
        if hw_pad128 != hw:
            out = out[:, :, :hw]
        return out.reshape(b, c, h, w)

    # ---- two-pass path ----
    # Spatial tile derived from the VMEM budget: per-column cost covers the
    # double-buffered x/out tiles plus f32 matmul temporaries; the per-batch
    # fixed cost covers the (C, C) attention block and the f32 accumulator.
    per_col = 4 * c * itemsize + 4 * c + 2 * c * cd_size
    fixed = 2 * c * c * itemsize + c * c * 4
    tile_budget = int(0.6 * budget) - fixed
    tile_max = 128
    if tile_budget > 0:
        tile_max = max(128, (tile_budget // per_col) // 128 * 128)
    if hw_tile is not None:
        tile_max = min(tile_max, _round_up(int(hw_tile), 128))
    tile = min(tile_max, hw_pad128)
    num_tiles = pl.cdiv(hw_pad128, tile)
    tile = _round_up(pl.cdiv(hw_pad128, num_tiles), 128)   # shrink tile -> minimal padding
    hw_pad = tile * num_tiles

    # Energy-column blocking for pass 1 (keeps both v7x TCs busy when B == 1 and
    # shrinks the f32 accumulator); needs C/n_cblk lane-aligned (multiple of 128).
    if n_cblk is None:
        n_cblk = 2 if (c >= 1024 and c % 256 == 0) else 1
    if n_cblk > 1 and (c % n_cblk != 0 or (c // n_cblk) % 128 != 0):
        n_cblk = 1
    tc = c // n_cblk

    if hw_pad != hw:
        xf = jnp.pad(xf, ((0, 0), (0, 0), (0, hw_pad - hw)))

    # Pass 1: attn^T = softmax(x @ x^T)^T, accumulated over HW tiles.
    if n_cblk == 1:
        attn_t = pl.pallas_call(
            functools.partial(_energy_kernel, compute_dtype=compute_dtype),
            out_shape=jax.ShapeDtypeStruct((b, c, c), x.dtype),
            grid=(b, num_tiles),
            in_specs=[pl.BlockSpec((pl.Squeezed(), c, tile), lambda i, k: (i, 0, k))],
            out_specs=pl.BlockSpec((pl.Squeezed(), c, c), lambda i, k: (i, 0, 0)),
            scratch_shapes=[pltpu.VMEM((c, c), jnp.float32)],
            compiler_params=pltpu.CompilerParams(
                dimension_semantics=("parallel", "arbitrary"),
                vmem_limit_bytes=budget,
            ),
        )(xf)
    else:
        attn_t = pl.pallas_call(
            functools.partial(_energy_kernel_blocked, compute_dtype=compute_dtype),
            out_shape=jax.ShapeDtypeStruct((b, c, c), x.dtype),
            grid=(b, n_cblk, num_tiles),
            in_specs=[
                pl.BlockSpec((pl.Squeezed(), c, tile), lambda i, j, k: (i, 0, k)),
                pl.BlockSpec((pl.Squeezed(), tc, tile), lambda i, j, k: (i, j, k)),
            ],
            out_specs=pl.BlockSpec((pl.Squeezed(), c, tc), lambda i, j, k: (i, 0, j)),
            scratch_shapes=[pltpu.VMEM((c, tc), jnp.float32)],
            compiler_params=pltpu.CompilerParams(
                dimension_semantics=("parallel", "parallel", "arbitrary"),
                vmem_limit_bytes=budget,
            ),
        )(xf, xf)

    # Pass 2: out = beta * (attn^T @ x) + x, tiled over batch x HW tiles.
    # The attn block index only changes per batch, so it is DMAed once per batch.
    out = pl.pallas_call(
        functools.partial(_apply_kernel, compute_dtype=compute_dtype),
        out_shape=jax.ShapeDtypeStruct((b, c, hw_pad), x.dtype),
        grid=(b, num_tiles),
        in_specs=[
            pl.BlockSpec(memory_space=pltpu.MemorySpace.SMEM),               # beta (1,)
            pl.BlockSpec((pl.Squeezed(), c, c), lambda i, k: (i, 0, 0)),     # attn^T
            pl.BlockSpec((pl.Squeezed(), c, tile), lambda i, k: (i, 0, k)),
        ],
        out_specs=pl.BlockSpec((pl.Squeezed(), c, tile), lambda i, k: (i, 0, k)),
        compiler_params=pltpu.CompilerParams(
            dimension_semantics=("parallel", "parallel"),
            vmem_limit_bytes=budget,
        ),
    )(beta, attn_t, xf)

    if hw_pad != hw:
        out = out[:, :, :hw]
    return out.reshape(b, c, h, w)


def da_channel_attention_ref(x, beta):
    """Pure-JAX reference matching the given PyTorch forward exactly (note: the
    module applies softmax(energy) directly, not the CAM `max - energy` variant)."""
    b, c, h, w = x.shape
    xf = x.reshape(b, c, h * w).astype(jnp.float32)
    energy = jnp.einsum('bcn,bdn->bcd', xf, xf)          # (B, C, C)
    attn = jax.nn.softmax(energy, axis=2)
    y = jnp.einsum('bdc,bdn->bcn', attn, xf)             # attn^T @ xf
    out = beta[0] * y + xf
    return out.reshape(b, c, h, w).astype(x.dtype)


if __name__ == "__main__":
    key = jax.random.PRNGKey(0)

    # (shape, input dtype, beta value, wrapper kwargs, max-abs-error tolerance)
    cases = [
        ((2, 8, 16, 16), jnp.float32, 0.0, {}, 2e-3),                        # fused, beta=0
        ((2, 8, 16, 16), jnp.float32, 0.5, {}, 2e-3),                        # fused
        ((2, 8, 16, 16), jnp.float32, 0.5, dict(fuse=False, hw_tile=128), 2e-3),   # two-pass, multi-tile
        ((1, 16, 13, 13), jnp.float32, 0.5, {}, 2e-3),                       # lane-padding path
        ((1, 256, 24, 24), jnp.float32, 0.7,
         dict(fuse=False, n_cblk=2, hw_tile=256), 2e-3),                     # blocked pass 1
        ((1, 16, 16, 16), jnp.bfloat16, 0.5, {}, 5e-2),                      # bf16 input
        ((2, 8, 16, 16), jnp.float32, 0.5,
         dict(fuse=False, hw_tile=128, compute_dtype=jnp.bfloat16), 5e-2),   # bf16 MXU operands
    ]

    for shape, dtype, beta_val, kwargs, tol in cases:
        key, sub = jax.random.split(key)
        # Moderate magnitudes so the softmax is non-degenerate and actually exercised.
        x = (0.1 * jax.random.normal(sub, shape, dtype=jnp.float32)).astype(dtype)
        beta = jnp.full((1,), beta_val, dtype=jnp.float32)

        out = jax.block_until_ready(da_channel_attention(x, beta, **kwargs))
        ref = da_channel_attention_ref(x, beta)

        assert out.shape == shape and out.dtype == x.dtype
        err = float(jnp.max(jnp.abs(out.astype(jnp.float32) - ref.astype(jnp.float32))))
        assert err <= tol, (f"mismatch at shape {shape}, dtype={dtype}, "
                            f"kwargs={kwargs}: max err {err}")

    print("KERNEL_OK")
</pallas_src>

<mosaic_0001>
module attributes {stable_mosaic.version = 11 : i64} {
  func.func @_fused_kernel(%arg0: i32, %arg1: memref<1xf32, #tpu.memory_space<smem>>, %arg2: memref<1x8x256xf32, #tpu.memory_space<vmem>>, %arg3: memref<1x8x256xf32, #tpu.memory_space<vmem>>) attributes {dimension_semantics = [#tpu.dimension_semantics<parallel>], iteration_bounds = array<i64: 2>, scalar_prefetch = 0 : i64, scratch_operands = 0 : i64, tpu.core_type = #tpu.core_type<tc>, window_params = [{transform_indices = @transform_0, window_bounds = array<i64: 1>}, {transform_indices = @transform_1, window_bounds = array<i64: 1, 8, 256>}, {transform_indices = @transform_2, window_bounds = array<i64: 1, 8, 256>}]} {
    %c0 = arith.constant 0 : index
    %c0_0 = arith.constant 0 : index
    %c0_1 = arith.constant 0 : index
    %0 = vector.load %arg2[%c0, %c0_0, %c0_1] : memref<1x8x256xf32, #tpu.memory_space<vmem>>, vector<1x8x256xf32>
    %1 = vector.shape_cast %0 : vector<1x8x256xf32> to vector<8x256xf32>
    %cst = arith.constant dense<0.000000e+00> : vector<8x8xf32>
    %2 = tpu.matmul %1, %1, %cst {dimension_numbers = #tpu.dot_dimension_numbers<[1], [1], [0], [0], [0, 0, 1, 0], [], []>} : vector<8x256xf32>, vector<8x256xf32>, vector<8x8xf32> -> vector<8x8xf32>
    %cst_2 = arith.constant dense<0xFF800000> : vector<8xf32>
    %3 = vector.multi_reduction <maximumf>, %2, %cst_2 [0] : vector<8x8xf32> to vector<8xf32>
    %4 = vector.shape_cast %3 : vector<8xf32> to vector<1x8xf32>
    %5 = vector.broadcast %4 : vector<1x8xf32> to vector<8x8xf32>
    %6 = arith.subf %2, %5 : vector<8x8xf32>
    %7 = math.exp %6 : vector<8x8xf32>
    %cst_3 = arith.constant dense<0.000000e+00> : vector<8xf32>
    %8 = vector.multi_reduction <add>, %7, %cst_3 [0] : vector<8x8xf32> to vector<8xf32>
    %9 = vector.shape_cast %8 : vector<8xf32> to vector<1x8xf32>
    %10 = vector.broadcast %9 : vector<1x8xf32> to vector<8x8xf32>
    %11 = arith.divf %7, %10 : vector<8x8xf32>
    %cst_4 = arith.constant dense<0.000000e+00> : vector<8x256xf32>
    %12 = tpu.matmul %11, %1, %cst_4 {dimension_numbers = #tpu.dot_dimension_numbers<[1], [0], [0], [1], [0, 0, 1, 1], [], []>} : vector<8x8xf32>, vector<8x256xf32>, vector<8x256xf32> -> vector<8x256xf32>
    %c0_5 = arith.constant 0 : index
    %13 = memref.load %arg1[%c0_5] : memref<1xf32, #tpu.memory_space<smem>>
    %14 = vector.broadcast %13 : f32 to vector<8x256xf32>
    %15 = arith.mulf %14, %12 : vector<8x256xf32>
    %16 = arith.addf %15, %1 : vector<8x256xf32>
    %c0_6 = arith.constant 0 : index
    %c0_7 = arith.constant 0 : index
    %c0_8 = arith.constant 0 : index
    %17 = vector.load %arg3[%c0_6, %c0_7, %c0_8] : memref<1x8x256xf32, #tpu.memory_space<vmem>>, vector<1x8x256xf32>
    %18 = vector.shape_cast %17 : vector<1x8x256xf32> to vector<8x256xf32>
    %19 = vector.shape_cast %16 : vector<8x256xf32> to vector<1x8x256xf32>
    tpu.vector_store %arg3[%c0_6, %c0_7, %c0_8], %19 {strides = array<i32>} : memref<1x8x256xf32, #tpu.memory_space<vmem>>, vector<1x8x256xf32>,
    return
  }
  func.func @transform_0(%arg0: i32) -> i32 {
    %c0_i32 = arith.constant 0 : i32
    %c0_i32_0 = arith.constant 0 : i32
    return %c0_i32 : i32
  }
  func.func @transform_1(%arg0: i32) -> (i32, i32, i32) {
    %c0_i32 = arith.constant 0 : i32
    %c0_i32_0 = arith.constant 0 : i32
    %c0_i32_1 = arith.constant 0 : i32
    return %arg0, %c0_i32, %c0_i32_0 : i32, i32, i32
  }
  func.func @transform_2(%arg0: i32) -> (i32, i32, i32) {
    %c0_i32 = arith.constant 0 : i32
    %c0_i32_0 = arith.constant 0 : i32
    %c0_i32_1 = arith.constant 0 : i32
    return %arg0, %c0_i32, %c0_i32_0 : i32, i32, i32
  }
}

</mosaic_0001>

<bundles_post_ra>
// kernel: tpu_custom_call.1
= control target key start
LH: loop header
LB: loop body
LE: loop exit
PB: predicated region body
PF: predicated region fallthrough
CT: control target
= control target key end

     0   :  { %s775_s0 = inlined_call_operand.<no memory space> [shape: f32[1], index: 0, kind: input, shape index: {}]   ;;  %s776_s1 = inlined_call_operand.hbm [shape: f32[2,8,256], index: 1, kind: input, shape index: {}]   ;;  %s777_s2 = inlined_call_operand.hbm [shape: f32[2,8,256], index: 2, kind: output, shape index: {}]  }
   0x1   :  { %7 = sst [smem:[#allocation2]] %s775_s0 }
   0x2   :  { %8 = vsyncpa [#allocation4], 0 }
   0x3   :  { %10 = vsyncpa [#allocation4 + $0x1], 0 }
   0x4   :  { %11 = vsyncpa [#allocation5], 0 }
   0x5   :  { %13 = vsyncpa [#allocation5 + $0x1], 0  ;;  %s607_s11 = smov 0   ;;  %s609_s12 = smov 0  }
   0x6   :  { %s611_s13 = smov 0   ;;  %s613_s14 = smov 0  }
   0x7 LB: > { %s628_s0 = sadd.s32 4294967295, %s584_s14   ;;  %s420_s15 = sadd.s32 4294967294, %s584_s14   ;;  %s584_s14 = sphi %s613_s14, %s792_s14   ;;  %s580_s13 = sphi %s611_s13, %s791_s13   ;;  %s576_s12 = sphi %s609_s12, %s790_s12   ;;  %s572_s11 = sphi %s607_s11, %s789_s11  }
   0x8   : > { %s632_s16 = sadd.s32 1, %s584_s14   ;;  %s47_s17 = sadd.s32 1, %s580_s13 }
   0x9   : > { %s44_s18 = ssub.s32 %s584_s14, %s632_s16  ;;  %p54_p0 = scmp.ne.s32.totalorder %s580_s13, %s576_s12 }
   0xa   : > { %p45_p1 = scmp.eq.s32.totalorder %s44_s18, 0  ;;  %p55_p2 = scmp.eq.s32.totalorder %s584_s14, 0 }
   0xb   : > { %p60_p3 = scmp.ne.s32.totalorder %s576_s12, %s572_s11  ;;  %p61_p4 = scmp.eq.s32.totalorder %s628_s0, 0 }
   0xc   : > { %s644_s19 = scalar_select %p45_p1, %s580_s13, %s47_s17  }
   0xd   : > { %p646_p5 = por %p55_p2, %p54_p0  ;;  %p650_p6 = por %p61_p4, %p60_p3 }
   0xe   : > { %p84_p7 = scmp.eq.s32.totalorder %s628_s0, 1  ;;  %p90_p8 = scmp.eq.s32.totalorder %s420_s15, 1 }
   0xf   : > { %p449_p10 = scmp.lt.s32.totalorder %s584_s14, 2  ;;  %s113_s24 = sand.u32 1, %s580_s13  }
  0x10   : > { %p657_p11 = por %p84_p7, %p54_p0  ;;  %p661_p12 = por %p90_p8, %p60_p3 }
  0x11   : > { %s435_s25 = sshll.u32 %s584_s14, 8  ;;  %s423_s26 = sshll.u32 %s113_s24, 4 }
  0x12   : > { %s781_s22 = scalar_select %p657_p11, 1, 0 }
  0x13   : > { %s782_s23 = scalar_select %p661_p12, 1, 0 }
  0x14   : > { %s670_s29 = scalar_lea.hbm %s776_s1, %s435_s25  ;;  %s117_s30 = scalar_lea.vmem [#allocation3], %s423_s26 }
  0x15   : > { %s125_s3 = sshll.u32 %s117_s30, 4  ;;  %p674_p13 = pnand %p449_p10, %p646_p5  ;;  %s678_s3 = int_to_ptr.vmem [resolvable:$true] %s125_s3 }
  0x16   : > { %s114_s5 = scalar_lea.sflag [#allocation4], %s113_s24  ;;  %s488_s6 = scalar_lea.hbm %s670_s29, 256 }
  0x17   : > { %p489_p2 = scmp.ne.s32.totalorder %s670_s29, %s488_s6  ;;  %p490_p3 = pneg %p674_p13 }
  0x18   : > { %s493_s9 = scalar_lea.hbm %s776_s1, 512  ;;  %p494_p5 = scmp.lt.u32.totalorder %s670_s29, %s776_s1 }
  0x19   : > { %p491_p4 = pnand %p490_p3, %p489_p2  ;;  %p495_p8 = scmp.lt.u32.totalorder %s493_s9, %s488_s6 }
  0x1a   : > { %p497_p9 = scmp.lt.u32.totalorder %s488_s6, %s670_s29 }
  0x1b   : > { %p492_p7 = pneg %p491_p4  ;;  %p496_p10 = por %p495_p8, %p494_p5 }
  0x1d   : > { %p498_p0 = por %p497_p9, %p496_p10 }
  0x1f   : > { %p499_p1 = pnand %p498_p0, %p492_p7 }
  0x21   : > { %502 = shalt.err (!%p499_p1)
}
  0x22   : > { %s503_s17 = scalar_lea.vmem %s678_s3, 256  ;;  %s586_s18 = smov [#allocation3]  }
  0x23   : > { %p504_p2 = scmp.ne.s32.totalorder %s678_s3, %s503_s17  ;;  %s508_s20 = sshll.u32 %s586_s18, 4  ;;  %s509_s20 = int_to_ptr.vmem [resolvable:$false] %s508_s20 }
  0x24   : > { %s510_s24 = scalar_lea.vmem %s509_s20, 512  ;;  %p511_p11 = scmp.lt.s32.totalorder %s678_s3, %s509_s20 }
  0x25   : > { %p506_p4 = pnand %p504_p2, %p490_p3  ;;  %p512_p5 = scmp.lt.s32.totalorder %s510_s24, %s503_s17 }
  0x27   : > { %p507_p12 = pneg %p506_p4  ;;  %p513_p8 = por %p512_p5, %p511_p11 }
  0x29   : > { %p514_p9 = pnand %p513_p8, %p507_p12 }
  0x2b   : > { %517 = shalt.err (!%p514_p9)
}
  0x2c   : > { %444 = dma.hbm_to_vmem [thread:$0]  (!%p674_p13), %s670_s29, 256, %s678_s3, %s114_s5  }
  0x2d   : > { %p784_p0 = scmp.lt.s32.totalorder %s584_s14, 3  ;;  %p785_p1 = scmp.ge.s32.totalorder %s584_s14, 1 }
  0x2f   : > { %p131_p3 = pnand %p785_p1, %p784_p0 }
  0x30   : > { %s712_s25 = sand.u32 (!%p131_p3), 1, %s576_s12  }
  0x31   : > { %134 = sbr.rel (%p131_p3) target bundleno = 559 (0x22f), region = 28  ;;  %s427_s26 = sshll.u32 (!%p131_p3), %s712_s25, 4 }
  0x32   : > { %s137_s27 = scalar_lea.sflag (!%p131_p3), [#allocation4], %s712_s25  ;;  %s140_s28 = scalar_lea.vmem (!%p131_p3), [#allocation3], %s427_s26 }
  0x38   : > { %563 = dma.done.wait (%p650_p6), %s137_s27, 256  }
  0x39   : > { %565 = vsyncadd (%p650_p6), %s137_s27, 4294967040  ;;  %v162_v0 = vld [vmem:[%s140_s28 + $0x8] sm:$0xff]  ;;  %v161_v1 = vld [vmem:[%s140_s28] sm:$0xff]  ;;  %v587_v2 = vmov 0.0   ;;  %vm233_vm0 = vcmask 64512   ;;  %s327_s21 = sld [smem:[#allocation2]] }
  0x3a   : > { %163 = vmatprep.subr.mxu0 %v162_v0  ;;  %227 = vmatprep.mubr.f32.mxu0 %v162_v0  ;;  %s436_s29 = sshll.u32 %s628_s0, 8  ;;  %s160_s30 = scalar_lea.vmem [#allocation6], %s427_s26 }
  0x3b   : > { %164 = vmatpush1.xpose.msra.mxu0 %v161_v1  ;;  %256 = vmatprep.subr.mxu1 %v162_v0  ;;  %s350_s3 = sshll.u32 %s160_s30, 4  ;;  %s731_s6 = scalar_lea.hbm %s777_s2, %s436_s29  ;;  %s733_s3 = int_to_ptr.vmem [resolvable:$true] %s350_s3 }
  0x3c   : > { %257 = vmatpush1.msra.mxu1 %v161_v1  ;;  %320 = vmatprep.mubr.f32.mxu1 %v587_v2  ;;  %s336_s7 = scalar_lea.sflag [#allocation5], %s712_s25  ;;  %s518_s0 = scalar_lea.vmem %s733_s3, 256 }
  0x3d   : > { %p519_p6 = scmp.ne.s32.totalorder %s733_s3, %s518_s0  ;;  %p786_p11 = scmp.ne.s32.totalorder %s781_s22, 0 }
  0x3e   : > { %228 = vmatmul.mubr.f32.vlgmr.msra.gmra.mrb[0].mxu0 %v161_v1  ;;  %s588_s8 = smov [#allocation6]  }
  0x3f   : > { %v328_v24 = vstv %s327_s21  ;;  %p520_p12 = pnand %p519_p6, %p786_p11  ;;  %s522_s9 = sshll.u32 %s588_s8, 4  ;;  %s523_s9 = int_to_ptr.vmem [resolvable:$false] %s522_s9 }
  0x40   : > { %s524_s10 = scalar_lea.vmem %s523_s9, 512  ;;  %p525_p7 = scmp.lt.s32.totalorder %s733_s3, %s523_s9 }
  0x41   : > { %p521_p13 = pneg %p520_p12  ;;  %p526_p10 = scmp.lt.s32.totalorder %s524_s10, %s518_s0 }
  0x43   : > { %p527_p2 = por %p526_p10, %p525_p7 }
  0x45   : > { %p528_p4 = pnand %p527_p2, %p521_p13 }
 0x111   : > { %v229_v3 = vpop.f32.mrb[0].mxu0 }
 0x112   : > { %v234_v4 = vsel %vm233_vm0, %v229_v3, -inf  ;;  %v231_v5 = vpop.f32.mrb[1].mxu0 }
 0x113   : > { %v235_v6 = vrot.slane %v234_v4, 4 }
 0x115   : > { %v236_v7 = vmax.f32 %v234_v4, %v235_v6 }
 0x117   : > { %v237_v8 = vrot.slane %v236_v7, 2 }
 0x119   : > { %v238_v9 = vmax.f32 %v236_v7, %v237_v8 }
 0x11b   : > { %v239_v10 = vrot.slane %v238_v9, 1 }
 0x11d   : > { %v240_v11 = vmax.f32 %v238_v9, %v239_v10 }
 0x11f   : > { %v241_v12 = vsub.f32 %v229_v3, %v240_v11 }
 0x121   : > { %v242_v13 = vmul.f32 1.442695, %v241_v12 }
 0x123   : > { %484 = vpow2.f32 %v242_v13 }
 0x12d   : > { %v485_v14 = vpop.eup %484 }
 0x12e   : > { %v244_v15 = vsel %vm233_vm0, %v485_v14, 0.0 }
 0x12f   : > { %v245_v16 = vrot.slane %v244_v15, 4 }
 0x131   : > { %v246_v17 = vadd.f32 %v245_v16, %v244_v15 }
 0x133   : > { %v247_v18 = vrot.slane %v246_v17, 2 }
 0x135   : > { %v248_v19 = vadd.f32 %v247_v18, %v246_v17 }
 0x137   : > { %v249_v20 = vrot.slane %v248_v19, 1 }
 0x139   : > { %v250_v21 = vadd.f32 %v249_v20, %v248_v19 }
 0x13b   : > { %486 = vrcp.f32 %v250_v21 }
 0x145   : > { %v487_v22 = vpop.eup %486 }
 0x146   : > { %v252_v23 = vmul.f32 %v487_v22, %v485_v14 }
 0x148   : > { %429 = vmatmul.mubr.msk.f32.vlgmr.msra.gmra.mrb[0].mxu1 %vm233_vm0, %v252_v23 }
 0x21b   : > { %v322_v25 = vpop.f32.mrb[0].mxu1 }
 0x21c   : > { %v329_v26 = vmul.f32 %v328_v24, %v322_v25  ;;  %v324_v27 = vpop.f32.mrb[1].mxu1 }
 0x21d   : > { %v330_v28 = vmul.f32 %v328_v24, %v324_v27 }
 0x21e   : > { %v331_v29 = vadd.f32 %v329_v26, %v161_v1 }
 0x21f   : > { %v332_v30 = vadd.f32 %v330_v28, %v162_v0 }
 0x220   : > { %333 = vst [vmem:[%s160_s30] sm:$0xff] %v331_v29 }
 0x221   : > { %334 = vst [vmem:[%s160_s30 + $0x8] sm:$0xff] %v332_v30 }
 0x222   : > { %531 = shalt.err (!%p528_p4)
}
 0x223   : > { %s532_s15 = scalar_lea.hbm %s731_s6, 256  ;;  %s536_s20 = scalar_lea.hbm %s777_s2, 512 }
 0x224   : > { %p533_p5 = scmp.ne.s32.totalorder %s731_s6, %s532_s15  ;;  %p537_p0 = scmp.lt.u32.totalorder %s731_s6, %s777_s2 }
 0x225   : > { %p538_p1 = scmp.lt.u32.totalorder %s536_s20, %s532_s15  ;;  %p540_p6 = scmp.lt.u32.totalorder %s532_s15, %s731_s6 }
 0x226   : > { %p534_p8 = pnand %p533_p5, %p786_p11 }
 0x227   : > { %p539_p3 = por %p538_p1, %p537_p0 }
 0x228   : > { %p535_p9 = pneg %p534_p8 }
 0x229   : > { %p541_p12 = por %p540_p6, %p539_p3 }
 0x22b   : > { %p542_p13 = pnand %p541_p12, %p535_p9 }
 0x22d   : > { %545 = shalt.err (!%p542_p13)
}
 0x22e   : > { %439 = dma.vmem_to_hbm [thread:$0]  (%p786_p11), %s733_s3, 256, %s731_s6, %s336_s7  }
 0x22f PF: > { %s362_s26 = sand.u32 1, %s572_s11   ;;  %p787_p7 = scmp.ne.s32.totalorder %s782_s23, 0 }
 0x230   : > { %p788_p10 = scmp.ge.s32.totalorder %s584_s14, 2  ;;  %s363_s27 = scalar_lea.sflag [#allocation5], %s362_s26 }
 0x232   : > { %p446_p2 = pnand %p788_p10, %p787_p7 }
 0x234   : > { %567 = dma.done.wait (!%p446_p2), %s363_s27, 256  }
 0x235   : > { %569 = vsyncadd (!%p446_p2), %s363_s27, 4294967040  ;;  %p16_p4 = scmp.ge.s32.totalorder %s632_s16, 4   ;;  %s789_s11 = smov %s576_s12 }
 0x236   : > { %s790_s12 = smov %s580_s13  ;;  %s791_s13 = smov %s644_s19 }
 0x237   : > { %s792_s14 = smov %s632_s16  ;;  %18 = sbr.rel (!%p16_p4) target bundleno = 7 (0x7), region = 73 }
 0x23e   :  { %368 = vsyncpa [#allocation4], 1 }
 0x23f   :  { %370 = vsyncpa [#allocation4 + $0x1], 1 }
 0x240   :  { %371 = vsyncpa [#allocation5], 1 }
 0x241   :  { %373 = vsyncpa [#allocation5 + $0x1], 1 }

</bundles_post_ra>
